<compile_context>
chip_gen: v7x
topology: tpu7x:2x2x1
jax: 0.10.0
libtpu: 0.0.40
codegen_flags: <defaults>
</compile_context>

<pallas_src>
import functools
import math

import jax
import jax.numpy as jnp
from jax import lax
from jax.experimental import pallas as pl
from jax.experimental.pallas import tpu as pltpu


def _vmem_limit_bytes():
    """~75% of the physical VMEM of the current generation, capped at 112 MiB."""
    try:
        cap = int(pltpu.get_tpu_info().vmem_capacity_bytes)
        if cap <= 0:
            raise ValueError("bad vmem capacity")
    except Exception:
        cap = 64 * 1024 * 1024  # conservative (v7x-sized) fallback
    return int(min(cap * 3 // 4, 112 * 1024 * 1024))


def _mha_flash_kernel(x_q_ref, x_kv_ref, wq_ref, wk_ref, wv_ref, wo_ref, bo_ref,
                      o_ref,
                      q_scr, m_scr, l_scr, acc_scr,
                      *, num_heads, head_dim, block_q, block_kv, mxu_dtype,
                      approx_reciprocal):
    H, hd, Tq, Tk = num_heads, head_dim, block_q, block_kv
    qi = pl.program_id(1)
    ki = pl.program_id(2)

    @pl.when(ki == 0)
    def _init():
        # Q projection for this (batch, q-tile), once per kv sweep.
        # Full-width lane-dense matmul: (D_out, D_in) @ (D_in, Tq).
        # 1/sqrt(head_dim) is already folded into wq (prepare_params).
        xq_t = jnp.transpose(x_q_ref[0]).astype(mxu_dtype)              # (D_in, Tq)
        q_t = jnp.dot(wq_ref[...], xq_t,
                      preferred_element_type=jnp.float32)               # (D_out, Tq)
        # Head split = leading-dim reshape, then a supported minor transpose.
        q = jnp.swapaxes(q_t.reshape(H, hd, Tq), 1, 2)                  # (H, Tq, hd)
        q_scr[...] = q.astype(mxu_dtype)
        m_scr[...] = jnp.full(m_scr.shape, -1e30, dtype=jnp.float32)    # finite init
        l_scr[...] = jnp.zeros(l_scr.shape, dtype=jnp.float32)
        acc_scr[...] = jnp.zeros(acc_scr.shape, dtype=jnp.float32)

    # Causal tile skipping: process only kv tiles that contain >= 1 unmasked col.
    @pl.when(ki * Tk <= qi * Tq + (Tq - 1))
    def _process():
        xkv_t = jnp.transpose(x_kv_ref[0]).astype(mxu_dtype)            # (D_in, Tk)
        # K / V projections, full-width lane-dense; results kept in their
        # natural transposed (H, hd, Tk) layout (no further transposes).
        k_t = jnp.dot(wk_ref[...], xkv_t, preferred_element_type=jnp.float32)
        v_t = jnp.dot(wv_ref[...], xkv_t, preferred_element_type=jnp.float32)
        k_t = k_t.reshape(H, hd, Tk).astype(mxu_dtype)                  # (H, hd, Tk)
        v_t = v_t.reshape(H, hd, Tk).astype(mxu_dtype)

        # Scores: canonical batched matmul over heads, contracting head_dim.
        s = jnp.einsum('hqd,hdk->hqk', q_scr[...], k_t,
                       preferred_element_type=jnp.float32)              # (H, Tq, Tk)

        # Finite causal bias in f32 (non-zero only on the diagonal tile).
        row = qi * Tq + lax.broadcasted_iota(jnp.int32, (Tq, Tk), 0)
        col = ki * Tk + lax.broadcasted_iota(jnp.int32, (Tq, Tk), 1)
        bias = jnp.where(col > row, jnp.float32(-1e30), jnp.float32(0.0))
        s = s + bias[None]

        # Online softmax (f32 on VPU/EUP) with deferred normalization.
        m_prev = m_scr[...]
        m_new = jnp.maximum(m_prev, jnp.max(s, axis=-1, keepdims=True))
        alpha = jnp.exp(m_prev - m_new)
        p = jnp.exp(s - m_new)                                          # unnormalized
        l_scr[...] = alpha * l_scr[...] + jnp.sum(p, axis=-1, keepdims=True)
        pv = jnp.einsum('hqk,hdk->hqd', p.astype(mxu_dtype), v_t,
                        preferred_element_type=jnp.float32)             # (H, Tq, hd)
        acc_scr[...] = alpha * acc_scr[...] + pv
        m_scr[...] = m_new

    @pl.when(ki == pl.num_programs(2) - 1)
    def _finalize():
        inv_l = pl.reciprocal(l_scr[...], approx=approx_reciprocal)     # (H, Tq, 1)
        ctx = (acc_scr[...] * inv_l).astype(mxu_dtype)                  # (H, Tq, hd)
        # Output projection; concat(heads) @ Wo == sum_h ctx_h @ Wo_h.
        out_h = jnp.einsum('hqd,hdn->hqn', ctx, wo_ref[...],
                           preferred_element_type=jnp.float32)          # (H, Tq, D_out)
        out = jnp.sum(out_h, axis=0) + bo_ref[...]                      # (Tq, D_out)
        o_ref[0] = out.astype(o_ref.dtype)                              # lane-dense store


def prepare_params(wq, wk, wv, wo, bo, *, num_heads, mxu_dtype=jnp.bfloat16):
    """One-time weight re-layout + cast (hoisted out of the per-call path).

    wq/wk/wv/wo are torch.nn.Linear weights (out_features, in_features);
    bo is the output-projection bias (out_features,).
    """
    D_out, D_in = wq.shape
    assert D_out % num_heads == 0
    hd = D_out // num_heads
    scale = 1.0 / math.sqrt(hd)
    return {
        "wq": (wq * scale).astype(mxu_dtype),       # (D_out, D_in), scale folded in
        "wk": wk.astype(mxu_dtype),                 # (D_out, D_in)
        "wv": wv.astype(mxu_dtype),                 # (D_out, D_in)
        "wo_h": jnp.transpose(wo).reshape(num_heads, hd, D_out).astype(mxu_dtype),
        "bo": bo.reshape(1, D_out).astype(jnp.float32),
    }


def multi_head_attention(x, params, *, block_q=None, block_kv=None,
                         approx_reciprocal=True):
    """Causal multi-head self-attention forward.  x: (B, T, D_in)."""
    B, T, D_in = x.shape
    wq = params["wq"]
    wo_h = params["wo_h"]
    D_out = wq.shape[0]
    H, hd, _ = wo_h.shape
    mxu_dtype = wq.dtype

    if block_q is None:
        block_q = 128 if T % 128 == 0 else T
    if block_kv is None:
        block_kv = 128 if T % 128 == 0 else T
    assert T % block_q == 0 and T % block_kv == 0

    grid = (B, T // block_q, T // block_kv)   # >= 2 parallel steps when B*q_tiles >= 2

    kernel = functools.partial(
        _mha_flash_kernel, num_heads=H, head_dim=hd, block_q=block_q,
        block_kv=block_kv, mxu_dtype=mxu_dtype,
        approx_reciprocal=approx_reciprocal)

    out = pl.pallas_call(
        kernel,
        out_shape=jax.ShapeDtypeStruct((B, T, D_out), x.dtype),
        grid_spec=pltpu.PrefetchScalarGridSpec(
            num_scalar_prefetch=0,
            grid=grid,
            in_specs=[
                pl.BlockSpec((1, block_q, D_in), lambda b, qi, ki: (b, qi, 0)),
                pl.BlockSpec((1, block_kv, D_in), lambda b, qi, ki: (b, ki, 0)),
                pl.BlockSpec((D_out, D_in), lambda b, qi, ki: (0, 0)),
                pl.BlockSpec((D_out, D_in), lambda b, qi, ki: (0, 0)),
                pl.BlockSpec((D_out, D_in), lambda b, qi, ki: (0, 0)),
                pl.BlockSpec((H, hd, D_out), lambda b, qi, ki: (0, 0, 0)),
                pl.BlockSpec((1, D_out), lambda b, qi, ki: (0, 0)),
            ],
            out_specs=pl.BlockSpec((1, block_q, D_out),
                                   lambda b, qi, ki: (b, qi, 0)),
            scratch_shapes=[
                pltpu.VMEM((H, block_q, hd), mxu_dtype),    # scaled Q tile
                pltpu.VMEM((H, block_q, 1), jnp.float32),   # running max m
                pltpu.VMEM((H, block_q, 1), jnp.float32),   # running denom l
                pltpu.VMEM((H, block_q, hd), jnp.float32),  # unnormalized acc
            ],
        ),
        compiler_params=pltpu.CompilerParams(
            dimension_semantics=("parallel", "parallel", "arbitrary"),
            vmem_limit_bytes=_vmem_limit_bytes(),
        ),
    )(x, x, params["wq"], params["wk"], params["wv"], params["wo_h"], params["bo"])
    return out


def _reference(x, wq, wk, wv, wo, bo, num_heads):
    """Pure-JAX mirror of the torch module (torch Linear weight layout)."""
    B, T, D_in = x.shape
    D_out = wq.shape[0]
    hd = D_out // num_heads
    q = (x @ wq.T).reshape(B, T, num_heads, hd).transpose(0, 2, 1, 3)
    k = (x @ wk.T).reshape(B, T, num_heads, hd).transpose(0, 2, 1, 3)
    v = (x @ wv.T).reshape(B, T, num_heads, hd).transpose(0, 2, 1, 3)
    s = jnp.einsum("bhqd,bhkd->bhqk", q, k)
    mask = jnp.triu(jnp.ones((T, T), bool), k=1)
    s = jnp.where(mask[None, None], -jnp.inf, s)
    a = jax.nn.softmax(s / math.sqrt(hd), axis=-1)
    ctx = jnp.einsum("bhqk,bhkd->bhqd", a, v).transpose(0, 2, 1, 3).reshape(B, T, D_out)
    return ctx @ wo.T + bo


if __name__ == "__main__":
    # Module config: in_dim=32, out_dim=32, context_length=8, dropout=0.0,
    # num_heads=4, qkv_bias=False.
    B, T, D_in, D_out, H = 2, 8, 32, 32, 4

    key = jax.random.PRNGKey(0)
    kx, kq, kk, kv, ko, kb = jax.random.split(key, 6)

    x = jax.random.normal(kx, (B, T, D_in), dtype=jnp.float32)
    # torch.nn.Linear weight layout: (out_features, in_features).
    wq = jax.random.normal(kq, (D_out, D_in), dtype=jnp.float32) * 0.1
    wk = jax.random.normal(kk, (D_out, D_in), dtype=jnp.float32) * 0.1
    wv = jax.random.normal(kv, (D_out, D_in), dtype=jnp.float32) * 0.1
    wo = jax.random.normal(ko, (D_out, D_out), dtype=jnp.float32) * 0.1
    bo = jax.random.normal(kb, (D_out,), dtype=jnp.float32) * 0.1

    with jax.default_matmul_precision("highest"):
        ref = _reference(x, wq, wk, wv, wo, bo, H)

    # Default path: bf16 MXU operands, f32 accumulation + f32 softmax.
    params_bf16 = prepare_params(wq, wk, wv, wo, bo, num_heads=H,
                                 mxu_dtype=jnp.bfloat16)
    out = multi_head_attention(x, params_bf16)
    out = jax.block_until_ready(out)
    assert out.shape == (B, T, D_out)
    assert jnp.allclose(out, ref, atol=5e-2, rtol=5e-2), "bf16-operand path mismatch"

    # f32-operand path with exact softmax division: tighter semantic check.
    params_f32 = prepare_params(wq, wk, wv, wo, bo, num_heads=H,
                                mxu_dtype=jnp.float32)
    out_f32 = multi_head_attention(x, params_f32, approx_reciprocal=False)
    out_f32 = jax.block_until_ready(out_f32)
    assert jnp.allclose(out_f32, ref, atol=1e-2, rtol=1e-2), "f32 path mismatch"

    print("KERNEL_OK")
</pallas_src>

<mosaic_0001>
module attributes {stable_mosaic.version = 11 : i64} {
  func.func @_mha_flash_kernel(%arg0: i32, %arg1: i32, %arg2: i32, %arg3: memref<1x8x32xf32, #tpu.memory_space<vmem>>, %arg4: memref<1x8x32xf32, #tpu.memory_space<vmem>>, %arg5: memref<32x32xbf16, #tpu.memory_space<vmem>>, %arg6: memref<32x32xbf16, #tpu.memory_space<vmem>>, %arg7: memref<32x32xbf16, #tpu.memory_space<vmem>>, %arg8: memref<4x8x32xbf16, #tpu.memory_space<vmem>>, %arg9: memref<1x32xf32, #tpu.memory_space<vmem>>, %arg10: memref<1x8x32xf32, #tpu.memory_space<vmem>>, %arg11: memref<4x8x8xbf16, #tpu.memory_space<vmem>>, %arg12: memref<4x8x1xf32, #tpu.memory_space<vmem>>, %arg13: memref<4x8x1xf32, #tpu.memory_space<vmem>>, %arg14: memref<4x8x8xf32, #tpu.memory_space<vmem>>) attributes {dimension_semantics = [#tpu.dimension_semantics<parallel>, #tpu.dimension_semantics<parallel>, #tpu.dimension_semantics<arbitrary>], iteration_bounds = array<i64: 2, 1, 1>, scalar_prefetch = 0 : i64, scratch_operands = 4 : i64, tpu.core_type = #tpu.core_type<tc>, window_params = [{transform_indices = @transform_0, window_bounds = array<i64: 1, 8, 32>}, {transform_indices = @transform_1, window_bounds = array<i64: 1, 8, 32>}, {pipeline_mode = #tpu.pipeline_mode<synchronous>, transform_indices = @transform_2, window_bounds = array<i64: 32, 32>}, {pipeline_mode = #tpu.pipeline_mode<synchronous>, transform_indices = @transform_3, window_bounds = array<i64: 32, 32>}, {pipeline_mode = #tpu.pipeline_mode<synchronous>, transform_indices = @transform_4, window_bounds = array<i64: 32, 32>}, {pipeline_mode = #tpu.pipeline_mode<synchronous>, transform_indices = @transform_5, window_bounds = array<i64: 4, 8, 32>}, {pipeline_mode = #tpu.pipeline_mode<synchronous>, transform_indices = @transform_6, window_bounds = array<i64: 1, 32>}, {transform_indices = @transform_7, window_bounds = array<i64: 1, 8, 32>}]} {
    %c0_i32 = arith.constant 0 : i32
    %0 = arith.cmpi eq, %arg2, %c0_i32 : i32
    %1 = arith.extui %0 : i1 to i32
    %c0_i32_0 = arith.constant 0 : i32
    %2 = arith.cmpi ne, %1, %c0_i32_0 : i32
    scf.if %2 {
      %c0 = arith.constant 0 : index
      %c0_5 = arith.constant 0 : index
      %c0_6 = arith.constant 0 : index
      %12 = vector.load %arg3[%c0, %c0_5, %c0_6] : memref<1x8x32xf32, #tpu.memory_space<vmem>>, vector<1x8x32xf32>
      %13 = vector.shape_cast %12 : vector<1x8x32xf32> to vector<8x32xf32>
      %14 = tpu.transpose %13, [1, 0] : vector<8x32xf32> -> vector<32x8xf32>
      %15 = arith.truncf %14 : vector<32x8xf32> to vector<32x8xbf16>
      %c0_7 = arith.constant 0 : index
      %c0_8 = arith.constant 0 : index
      %16 = vector.load %arg5[%c0_7, %c0_8] : memref<32x32xbf16, #tpu.memory_space<vmem>>, vector<32x32xbf16>
      %cst = arith.constant dense<0.000000e+00> : vector<32x8xf32>
      %17 = tpu.matmul %16, %15, %cst {dimension_numbers = #tpu.dot_dimension_numbers<[1], [0], [0], [1], [0, 0, 1, 1], [], []>} : vector<32x32xbf16>, vector<32x8xbf16>, vector<32x8xf32> -> vector<32x8xf32>
      %18 = vector.shape_cast %17 : vector<32x8xf32> to vector<4x8x8xf32>
      %19 = tpu.transpose %18, [0, 2, 1] : vector<4x8x8xf32> -> vector<4x8x8xf32>
      %20 = arith.truncf %19 : vector<4x8x8xf32> to vector<4x8x8xbf16>
      %c0_9 = arith.constant 0 : index
      %c0_10 = arith.constant 0 : index
      %c0_11 = arith.constant 0 : index
      %21 = vector.load %arg11[%c0_9, %c0_10, %c0_11] : memref<4x8x8xbf16, #tpu.memory_space<vmem>>, vector<4x8x8xbf16>
      tpu.vector_store %arg11[%c0_9, %c0_10, %c0_11], %20 {strides = array<i32>} : memref<4x8x8xbf16, #tpu.memory_space<vmem>>, vector<4x8x8xbf16>,
      %cst_12 = arith.constant -1.000000e+30 : f32
      %22 = vector.broadcast %cst_12 : f32 to vector<4x8x1xf32>
      %c0_13 = arith.constant 0 : index
      %c0_14 = arith.constant 0 : index
      %c0_15 = arith.constant 0 : index
      %23 = vector.load %arg12[%c0_13, %c0_14, %c0_15] : memref<4x8x1xf32, #tpu.memory_space<vmem>>, vector<4x8x1xf32>
      tpu.vector_store %arg12[%c0_13, %c0_14, %c0_15], %22 {strides = array<i32>} : memref<4x8x1xf32, #tpu.memory_space<vmem>>, vector<4x8x1xf32>,
      %cst_16 = arith.constant 0.000000e+00 : f32
      %24 = vector.broadcast %cst_16 : f32 to vector<4x8x1xf32>
      %c0_17 = arith.constant 0 : index
      %c0_18 = arith.constant 0 : index
      %c0_19 = arith.constant 0 : index
      %25 = vector.load %arg13[%c0_17, %c0_18, %c0_19] : memref<4x8x1xf32, #tpu.memory_space<vmem>>, vector<4x8x1xf32>
      tpu.vector_store %arg13[%c0_17, %c0_18, %c0_19], %24 {strides = array<i32>} : memref<4x8x1xf32, #tpu.memory_space<vmem>>, vector<4x8x1xf32>,
      %cst_20 = arith.constant 0.000000e+00 : f32
      %26 = vector.broadcast %cst_20 : f32 to vector<4x8x8xf32>
      %c0_21 = arith.constant 0 : index
      %c0_22 = arith.constant 0 : index
      %c0_23 = arith.constant 0 : index
      %27 = vector.load %arg14[%c0_21, %c0_22, %c0_23] : memref<4x8x8xf32, #tpu.memory_space<vmem>>, vector<4x8x8xf32>
      tpu.vector_store %arg14[%c0_21, %c0_22, %c0_23], %26 {strides = array<i32>} : memref<4x8x8xf32, #tpu.memory_space<vmem>>, vector<4x8x8xf32>,
    } else {
    }
    %c8_i32 = arith.constant 8 : i32
    %3 = arith.muli %arg2, %c8_i32 : i32
    %c8_i32_1 = arith.constant 8 : i32
    %4 = arith.muli %arg1, %c8_i32_1 : i32
    %c7_i32 = arith.constant 7 : i32
    %5 = arith.addi %4, %c7_i32 : i32
    %6 = arith.cmpi sle, %3, %5 : i32
    %7 = arith.extui %6 : i1 to i32
    %c0_i32_2 = arith.constant 0 : i32
    %8 = arith.cmpi ne, %7, %c0_i32_2 : i32
    scf.if %8 {
      %c0 = arith.constant 0 : index
      %c0_5 = arith.constant 0 : index
      %c0_6 = arith.constant 0 : index
      %12 = vector.load %arg4[%c0, %c0_5, %c0_6] : memref<1x8x32xf32, #tpu.memory_space<vmem>>, vector<1x8x32xf32>
      %13 = vector.shape_cast %12 : vector<1x8x32xf32> to vector<8x32xf32>
      %14 = tpu.transpose %13, [1, 0] : vector<8x32xf32> -> vector<32x8xf32>
      %15 = arith.truncf %14 : vector<32x8xf32> to vector<32x8xbf16>
      %c0_7 = arith.constant 0 : index
      %c0_8 = arith.constant 0 : index
      %16 = vector.load %arg6[%c0_7, %c0_8] : memref<32x32xbf16, #tpu.memory_space<vmem>>, vector<32x32xbf16>
      %cst = arith.constant dense<0.000000e+00> : vector<32x8xf32>
      %17 = tpu.matmul %16, %15, %cst {dimension_numbers = #tpu.dot_dimension_numbers<[1], [0], [0], [1], [0, 0, 1, 1], [], []>} : vector<32x32xbf16>, vector<32x8xbf16>, vector<32x8xf32> -> vector<32x8xf32>
      %c0_9 = arith.constant 0 : index
      %c0_10 = arith.constant 0 : index
      %18 = vector.load %arg7[%c0_9, %c0_10] : memref<32x32xbf16, #tpu.memory_space<vmem>>, vector<32x32xbf16>
      %cst_11 = arith.constant dense<0.000000e+00> : vector<32x8xf32>
      %19 = tpu.matmul %18, %15, %cst_11 {dimension_numbers = #tpu.dot_dimension_numbers<[1], [0], [0], [1], [0, 0, 1, 1], [], []>} : vector<32x32xbf16>, vector<32x8xbf16>, vector<32x8xf32> -> vector<32x8xf32>
      %20 = vector.shape_cast %17 : vector<32x8xf32> to vector<4x8x8xf32>
      %21 = arith.truncf %20 : vector<4x8x8xf32> to vector<4x8x8xbf16>
      %22 = vector.shape_cast %19 : vector<32x8xf32> to vector<4x8x8xf32>
      %23 = arith.truncf %22 : vector<4x8x8xf32> to vector<4x8x8xbf16>
      %c0_12 = arith.constant 0 : index
      %c0_13 = arith.constant 0 : index
      %c0_14 = arith.constant 0 : index
      %24 = vector.load %arg11[%c0_12, %c0_13, %c0_14] : memref<4x8x8xbf16, #tpu.memory_space<vmem>>, vector<4x8x8xbf16>
      "tpu.trace_start"() <{level = 10 : i32, message = "hqd,hdk->hqk"}> : () -> ()
      %cst_15 = arith.constant dense<0.000000e+00> : vector<4x8x8xf32>
      %25 = tpu.matmul %24, %21, %cst_15 {dimension_numbers = #tpu.dot_dimension_numbers<[2], [1], [1], [2], [0, 0, 0, 1, 1, 2], [0], [0]>} : vector<4x8x8xbf16>, vector<4x8x8xbf16>, vector<4x8x8xf32> -> vector<4x8x8xf32>
      "tpu.trace_stop"() : () -> ()
      %c8_i32_16 = arith.constant 8 : i32
      %26 = arith.muli %arg1, %c8_i32_16 : i32
      %27 = tpu.iota {dimensions = array<i32: 0>} : vector<8x8xi32>
      %28 = vector.broadcast %26 : i32 to vector<8x8xi32>
      %29 = arith.addi %28, %27 : vector<8x8xi32>
      %c8_i32_17 = arith.constant 8 : i32
      %30 = arith.muli %arg2, %c8_i32_17 : i32
      %31 = tpu.iota {dimensions = array<i32: 1>} : vector<8x8xi32>
      %32 = vector.broadcast %30 : i32 to vector<8x8xi32>
      %33 = arith.addi %32, %31 : vector<8x8xi32>
      %34 = arith.cmpi sgt, %33, %29 : vector<8x8xi32>
      %cst_18 = arith.constant -1.000000e+30 : f32
      %cst_19 = arith.constant 0.000000e+00 : f32
      %35 = vector.broadcast %cst_18 : f32 to vector<8x8xf32>
      %36 = vector.broadcast %cst_19 : f32 to vector<8x8xf32>
      %37 = arith.select %34, %35, %36 : vector<8x8xi1>, vector<8x8xf32>
      %38 = vector.shape_cast %37 : vector<8x8xf32> to vector<1x8x8xf32>
      %39 = vector.broadcast %38 : vector<1x8x8xf32> to vector<4x8x8xf32>
      %40 = arith.addf %25, %39 : vector<4x8x8xf32>
      %c0_20 = arith.constant 0 : index
      %c0_21 = arith.constant 0 : index
      %c0_22 = arith.constant 0 : index
      %41 = vector.load %arg12[%c0_20, %c0_21, %c0_22] : memref<4x8x1xf32, #tpu.memory_space<vmem>>, vector<4x8x1xf32>
      %cst_23 = arith.constant dense<0xFF800000> : vector<4x8xf32>
      %42 = vector.multi_reduction <maximumf>, %40, %cst_23 [2] : vector<4x8x8xf32> to vector<4x8xf32>
      %43 = vector.shape_cast %42 : vector<4x8xf32> to vector<4x8x1xf32>
      %44 = arith.maximumf %41, %43 : vector<4x8x1xf32>
      %45 = arith.subf %41, %44 : vector<4x8x1xf32>
      %46 = math.exp %45 : vector<4x8x1xf32>
      %47 = vector.broadcast %44 : vector<4x8x1xf32> to vector<4x8x8xf32>
      %48 = arith.subf %40, %47 : vector<4x8x8xf32>
      %49 = math.exp %48 : vector<4x8x8xf32>
      %c0_24 = arith.constant 0 : index
      %c0_25 = arith.constant 0 : index
      %c0_26 = arith.constant 0 : index
      %50 = vector.load %arg13[%c0_24, %c0_25, %c0_26] : memref<4x8x1xf32, #tpu.memory_space<vmem>>, vector<4x8x1xf32>
      %51 = arith.mulf %46, %50 : vector<4x8x1xf32>
      %cst_27 = arith.constant dense<0.000000e+00> : vector<4x8xf32>
      %52 = vector.multi_reduction <add>, %49, %cst_27 [2] : vector<4x8x8xf32> to vector<4x8xf32>
      %53 = vector.shape_cast %52 : vector<4x8xf32> to vector<4x8x1xf32>
      %54 = arith.addf %51, %53 : vector<4x8x1xf32>
      %c0_28 = arith.constant 0 : index
      %c0_29 = arith.constant 0 : index
      %c0_30 = arith.constant 0 : index
      %55 = vector.load %arg13[%c0_28, %c0_29, %c0_30] : memref<4x8x1xf32, #tpu.memory_space<vmem>>, vector<4x8x1xf32>
      tpu.vector_store %arg13[%c0_28, %c0_29, %c0_30], %54 {strides = array<i32>} : memref<4x8x1xf32, #tpu.memory_space<vmem>>, vector<4x8x1xf32>,
      %56 = arith.truncf %49 : vector<4x8x8xf32> to vector<4x8x8xbf16>
      "tpu.trace_start"() <{level = 10 : i32, message = "hqk,hdk->hqd"}> : () -> ()
      %cst_31 = arith.constant dense<0.000000e+00> : vector<4x8x8xf32>
      %57 = tpu.matmul %56, %23, %cst_31 {dimension_numbers = #tpu.dot_dimension_numbers<[2], [2], [1], [1], [0, 0, 0, 1, 1, 1], [0], [0]>} : vector<4x8x8xbf16>, vector<4x8x8xbf16>, vector<4x8x8xf32> -> vector<4x8x8xf32>
      "tpu.trace_stop"() : () -> ()
      %c0_32 = arith.constant 0 : index
      %c0_33 = arith.constant 0 : index
      %c0_34 = arith.constant 0 : index
      %58 = vector.load %arg14[%c0_32, %c0_33, %c0_34] : memref<4x8x8xf32, #tpu.memory_space<vmem>>, vector<4x8x8xf32>
      %59 = vector.broadcast %46 : vector<4x8x1xf32> to vector<4x8x8xf32>
      %60 = arith.mulf %59, %58 : vector<4x8x8xf32>
      %61 = arith.addf %60, %57 : vector<4x8x8xf32>
      %c0_35 = arith.constant 0 : index
      %c0_36 = arith.constant 0 : index
      %c0_37 = arith.constant 0 : index
      %62 = vector.load %arg14[%c0_35, %c0_36, %c0_37] : memref<4x8x8xf32, #tpu.memory_space<vmem>>, vector<4x8x8xf32>
      tpu.vector_store %arg14[%c0_35, %c0_36, %c0_37], %61 {strides = array<i32>} : memref<4x8x8xf32, #tpu.memory_space<vmem>>, vector<4x8x8xf32>,
      %c0_38 = arith.constant 0 : index
      %c0_39 = arith.constant 0 : index
      %c0_40 = arith.constant 0 : index
      %63 = vector.load %arg12[%c0_38, %c0_39, %c0_40] : memref<4x8x1xf32, #tpu.memory_space<vmem>>, vector<4x8x1xf32>
      tpu.vector_store %arg12[%c0_38, %c0_39, %c0_40], %44 {strides = array<i32>} : memref<4x8x1xf32, #tpu.memory_space<vmem>>, vector<4x8x1xf32>,
    } else {
    }
    %c0_i32_3 = arith.constant 0 : i32
    %9 = arith.cmpi eq, %arg2, %c0_i32_3 : i32
    %10 = arith.extui %9 : i1 to i32
    %c0_i32_4 = arith.constant 0 : i32
    %11 = arith.cmpi ne, %10, %c0_i32_4 : i32
    scf.if %11 {
      %c0 = arith.constant 0 : index
      %c0_5 = arith.constant 0 : index
      %c0_6 = arith.constant 0 : index
      %12 = vector.load %arg13[%c0, %c0_5, %c0_6] : memref<4x8x1xf32, #tpu.memory_space<vmem>>, vector<4x8x1xf32>
      %13 = tpu.reciprocal %12 {approx = true} : vector<4x8x1xf32> -> vector<4x8x1xf32>
      %c0_7 = arith.constant 0 : index
      %c0_8 = arith.constant 0 : index
      %c0_9 = arith.constant 0 : index
      %14 = vector.load %arg14[%c0_7, %c0_8, %c0_9] : memref<4x8x8xf32, #tpu.memory_space<vmem>>, vector<4x8x8xf32>
      %15 = vector.broadcast %13 : vector<4x8x1xf32> to vector<4x8x8xf32>
      %16 = arith.mulf %14, %15 : vector<4x8x8xf32>
      %17 = arith.truncf %16 : vector<4x8x8xf32> to vector<4x8x8xbf16>
      %c0_10 = arith.constant 0 : index
      %c0_11 = arith.constant 0 : index
      %c0_12 = arith.constant 0 : index
      %18 = vector.load %arg8[%c0_10, %c0_11, %c0_12] : memref<4x8x32xbf16, #tpu.memory_space<vmem>>, vector<4x8x32xbf16>
      "tpu.trace_start"() <{level = 10 : i32, message = "hqd,hdn->hqn"}> : () -> ()
      %cst = arith.constant dense<0.000000e+00> : vector<4x8x32xf32>
      %19 = tpu.matmul %17, %18, %cst {dimension_numbers = #tpu.dot_dimension_numbers<[2], [1], [1], [2], [0, 0, 0, 1, 1, 2], [0], [0]>} : vector<4x8x8xbf16>, vector<4x8x32xbf16>, vector<4x8x32xf32> -> vector<4x8x32xf32>
      "tpu.trace_stop"() : () -> ()
      %cst_13 = arith.constant dense<0.000000e+00> : vector<8x32xf32>
      %20 = vector.multi_reduction <add>, %19, %cst_13 [0] : vector<4x8x32xf32> to vector<8x32xf32>
      %c0_14 = arith.constant 0 : index
      %c0_15 = arith.constant 0 : index
      %21 = vector.load %arg9[%c0_14, %c0_15] : memref<1x32xf32, #tpu.memory_space<vmem>>, vector<1x32xf32>
      %22 = vector.broadcast %21 : vector<1x32xf32> to vector<8x32xf32>
      %23 = arith.addf %20, %22 : vector<8x32xf32>
      %c0_16 = arith.constant 0 : index
      %c0_17 = arith.constant 0 : index
      %c0_18 = arith.constant 0 : index
      %24 = vector.load %arg10[%c0_16, %c0_17, %c0_18] : memref<1x8x32xf32, #tpu.memory_space<vmem>>, vector<1x8x32xf32>
      %25 = vector.shape_cast %24 : vector<1x8x32xf32> to vector<8x32xf32>
      %26 = vector.shape_cast %23 : vector<8x32xf32> to vector<1x8x32xf32>
      tpu.vector_store %arg10[%c0_16, %c0_17, %c0_18], %26 {strides = array<i32>} : memref<1x8x32xf32, #tpu.memory_space<vmem>>, vector<1x8x32xf32>,
    } else {
    }
    return
  }
  func.func @transform_0(%arg0: i32, %arg1: i32, %arg2: i32) -> (i32, i32, i32) {
    %c0_i32 = arith.constant 0 : i32
    %c0_i32_0 = arith.constant 0 : i32
    return %arg0, %arg1, %c0_i32 : i32, i32, i32
  }
  func.func @transform_1(%arg0: i32, %arg1: i32, %arg2: i32) -> (i32, i32, i32) {
    %c0_i32 = arith.constant 0 : i32
    %c0_i32_0 = arith.constant 0 : i32
    return %arg0, %arg2, %c0_i32 : i32, i32, i32
  }
  func.func @transform_2(%arg0: i32, %arg1: i32, %arg2: i32) -> (i32, i32) {
    %c0_i32 = arith.constant 0 : i32
    %c0_i32_0 = arith.constant 0 : i32
    %c0_i32_1 = arith.constant 0 : i32
    return %c0_i32, %c0_i32_0 : i32, i32
  }
  func.func @transform_3(%arg0: i32, %arg1: i32, %arg2: i32) -> (i32, i32) {
    %c0_i32 = arith.constant 0 : i32
    %c0_i32_0 = arith.constant 0 : i32
    %c0_i32_1 = arith.constant 0 : i32
    return %c0_i32, %c0_i32_0 : i32, i32
  }
  func.func @transform_4(%arg0: i32, %arg1: i32, %arg2: i32) -> (i32, i32) {
    %c0_i32 = arith.constant 0 : i32
    %c0_i32_0 = arith.constant 0 : i32
    %c0_i32_1 = arith.constant 0 : i32
    return %c0_i32, %c0_i32_0 : i32, i32
  }
  func.func @transform_5(%arg0: i32, %arg1: i32, %arg2: i32) -> (i32, i32, i32) {
    %c0_i32 = arith.constant 0 : i32
    %c0_i32_0 = arith.constant 0 : i32
    %c0_i32_1 = arith.constant 0 : i32
    %c0_i32_2 = arith.constant 0 : i32
    return %c0_i32, %c0_i32_0, %c0_i32_1 : i32, i32, i32
  }
  func.func @transform_6(%arg0: i32, %arg1: i32, %arg2: i32) -> (i32, i32) {
    %c0_i32 = arith.constant 0 : i32
    %c0_i32_0 = arith.constant 0 : i32
    %c0_i32_1 = arith.constant 0 : i32
    return %c0_i32, %c0_i32_0 : i32, i32
  }
  func.func @transform_7(%arg0: i32, %arg1: i32, %arg2: i32) -> (i32, i32, i32) {
    %c0_i32 = arith.constant 0 : i32
    %c0_i32_0 = arith.constant 0 : i32
    return %arg0, %arg1, %c0_i32 : i32, i32, i32
  }
}

</mosaic_0001>

<bundles_post_ra>
// kernel: tpu_custom_call.1
= control target key start
LH: loop header
LB: loop body
LE: loop exit
PB: predicated region body
PF: predicated region fallthrough
CT: control target
= control target key end

     0   :  { %s2863_s0 = inlined_call_operand.hbm [shape: f32[2,8,32], index: 0, kind: input, shape index: {}]   ;;  %s2864_s1 = inlined_call_operand.hbm [shape: f32[2,8,32], index: 1, kind: input, shape index: {}]   ;;  %s2865_s2 = inlined_call_operand.hbm [shape: bf16[32,32], index: 2, kind: input, shape index: {}]   ;;  %s2866_s3 = inlined_call_operand.hbm [shape: bf16[32,32], index: 3, kind: input, shape index: {}]   ;;  %s2867_s4 = inlined_call_operand.hbm [shape: bf16[32,32], index: 4, kind: input, shape index: {}]   ;;  %s2868_s5 = inlined_call_operand.vmem [shape: bf16[4,8,32], index: 5, kind: input, shape index: {}]   ;;  %s2869_s6 = inlined_call_operand.vmem [shape: f32[1,32], index: 6, kind: input, shape index: {}]   ;;  %s2870_s7 = inlined_call_operand.hbm [shape: f32[2,8,32], index: 7, kind: output, shape index: {}]  }
   0x1   :  { %2878 = sst [smem:[#allocation23_spill]] %s2865_s2 }
   0x2   :  { %2879 = sst [smem:[#allocation24_spill]] %s2866_s3 }
   0x3   :  { %2880 = sst [smem:[#allocation25_spill]] %s2867_s4 }
   0x4   :  { %2881 = sst [smem:[#allocation26_spill]] %s2870_s7 }
   0x5   :  { %12 = vsyncpa [#allocation7], 0 }
   0x6   :  { %14 = vsyncpa [#allocation7 + $0x1], 0 }
   0x7   :  { %15 = vsyncpa [#allocation10], 0 }
   0x8   :  { %17 = vsyncpa [#allocation10 + $0x1], 0 }
   0x9   :  { %18 = vsyncpa [#allocation13], 0 }
   0xa   :  { %19 = vsyncpa [#allocation8], 0 }
   0xb   :  { %21 = vsyncpa [#allocation8 + $0x1], 0  ;;  %s2379_s24 = smov 0   ;;  %s2381_s25 = smov 0  }
   0xc   :  { %s2383_s26 = smov 0   ;;  %s2385_s27 = smov 0  }
   0xd   :  { %s2387_s28 = smov 0   ;;  %s2389_s29 = smov 0  }
   0xe LB: > { %2882 = sst [smem:[#allocation21_spill]] %s2305_s24  ;;  %s2410_s30 = sadd.s32 4294967295, %s2325_s29   ;;  %s2325_s29 = sphi %s2389_s29, %s27_s29   ;;  %s2321_s28 = sphi %s2387_s28, %s2911_s28   ;;  %s2317_s27 = sphi %s2385_s27, %s2910_s27   ;;  %s2313_s26 = sphi %s2383_s26, %s2909_s26   ;;  %s2309_s25 = sphi %s2381_s25, %s2908_s25   ;;  %s2305_s24 = sphi %s2379_s24, %s2907_s24  }
   0xf   : > { %s1773_s8 = sadd.s32 4294967294, %s2325_s29   ;;  %p68_p0 = scmp.ne.s32.totalorder %s2309_s25, %s2305_s24 }
  0x10   : > { %p2871_p1 = scmp.eq.s32.totalorder %s2410_s30, 0  ;;  %p233_p3 = scmp.eq.s32.totalorder %s1773_s8, 1 }
  0x11   : > { %p1774_p5 = scmp.ge.s32.totalorder %s2325_s29, 1  ;;  %p240_p7 = scmp.lt.s32.totalorder %s2325_s29, 3 }
  0x12   : > { %p2419_p4 = por %p2871_p1, %p68_p0  ;;  %p2424_p6 = por %p233_p3, %p68_p0 }
  0x13   : > { %p2429_p8 = pnand %p1774_p5, %p240_p7  ;;  %s2327_s12 = smov [#allocation11]  }
  0x14   : > { %s2883_s9 = scalar_select %p2419_p4, 1, 0 }
  0x15   : > { %s2884_s10 = scalar_select %p2424_p6, 1, 0 }
  0x16   : > { %s2886_s11 = scalar_select %p2429_p8, 1, 0 }
  0x17   : > { %2885 = sst [smem:[#allocation22_spill]] %s2884_s10  ;;  %s252_s13 = sshll.u32 %s2327_s12, 4  ;;  %s2433_s13 = int_to_ptr.vmem [resolvable:$true] %s252_s13 }
  0x18   : > { %p1969_p9 = pneg %p2429_p8  ;;  %s2328_s15 = smov [#allocation12]  }
  0x19   : > { %s265_s16 = sshll.u32 %s2328_s15, 4  ;;  %s2329_s17 = smov [#allocation14]   ;;  %s2444_s16 = int_to_ptr.vmem [resolvable:$true] %s265_s16 }
  0x1a   : > { %p2440_p11 = pnand %p1969_p9, %p2871_p1  ;;  %s2446_s18 = sshll.u32 %s2329_s17, 4  ;;  %s279_s18 = int_to_ptr.vmem [resolvable:$true] %s2446_s18 }
  0x1b   : > { %s2888_s2 = sld [smem:[#allocation23_spill]] }
  0x1c   : > { %p2456_p13 = pneg %p2440_p11 }
  0x21   : > { %s2087_s21 = scalar_lea.hbm %s2888_s2, 256 }
  0x22   : > { %p2088_p12 = scmp.ne.s32.totalorder %s2888_s2, %s2087_s21  ;;  %p2094_p5 = scmp.lt.u32.totalorder %s2087_s21, %s2888_s2 }
  0x24   : > { %p2090_p0 = pnand %p2456_p13, %p2088_p12 }
  0x26   : > { %p2091_p3 = pneg %p2090_p0 }
  0x28   : > { %p2096_p7 = pnand %p2094_p5, %p2091_p3 }
  0x2a   : > { %2099 = shalt.err (!%p2096_p7)
}
  0x2b   : > { %s2100_s17 = scalar_lea.vmem %s2433_s13, 256  ;;  %p2108_p2 = scmp.lt.s32.totalorder %s2433_s13, %s2433_s13 }
  0x2c   : > { %p2101_p9 = scmp.ne.s32.totalorder %s2433_s13, %s2100_s17  ;;  %p2109_p6 = scmp.lt.s32.totalorder %s2100_s17, %s2100_s17 }
  0x2e   : > { %p2103_p10 = pnand %p2101_p9, %p2456_p13  ;;  %p2110_p12 = por %p2109_p6, %p2108_p2 }
  0x30   : > { %p2104_p1 = pneg %p2103_p10 }
  0x32   : > { %p2111_p0 = pnand %p2110_p12, %p2104_p1 }
  0x34   : > { %2114 = shalt.err (!%p2111_p0)
}
  0x35   : > { %s2330_s19 = smov 64   ;;  %s2331_s20 = smov 4  }
  0x36   : > { %1972 = dma.hbm_to_vmem [thread:$0]  (!%p2440_p11), %s2888_s2, 256, %s2433_s13, [#allocation10], %s2330_s19, %s2330_s19, %s2331_s20  }
  0x37   : > { %s2890_s3 = sld [smem:[#allocation24_spill]] }
  0x3d   : > { %s2115_s15 = scalar_lea.hbm %s2890_s3, 256 }
  0x3e   : > { %p2116_p1 = scmp.ne.s32.totalorder %s2890_s3, %s2115_s15  ;;  %p2122_p10 = scmp.lt.u32.totalorder %s2115_s15, %s2890_s3 }
  0x40   : > { %p2118_p2 = pnand %p2116_p1, %p2456_p13 }
  0x42   : > { %p2119_p6 = pneg %p2118_p2 }
  0x44   : > { %p2124_p3 = pnand %p2122_p10, %p2119_p6 }
  0x46   : > { %2127 = shalt.err (!%p2124_p3)
}
  0x47   : > { %s2128_s13 = scalar_lea.vmem %s2444_s16, 256  ;;  %p2136_p12 = scmp.lt.s32.totalorder %s2444_s16, %s2444_s16 }
  0x48   : > { %p2129_p5 = scmp.ne.s32.totalorder %s2444_s16, %s2128_s13  ;;  %p2137_p0 = scmp.lt.s32.totalorder %s2128_s13, %s2128_s13 }
  0x4a   : > { %p2131_p7 = pnand %p2129_p5, %p2456_p13  ;;  %p2138_p1 = por %p2137_p0, %p2136_p12 }
  0x4c   : > { %p2132_p9 = pneg %p2131_p7 }
  0x4e   : > { %p2139_p2 = pnand %p2138_p1, %p2132_p9 }
  0x50   : > { %2142 = shalt.err (!%p2139_p2)
}
  0x51   : > { %1975 = dma.hbm_to_vmem [thread:$0]  (!%p2440_p11), %s2890_s3, 256, %s2444_s16, [#allocation13], %s2330_s19, %s2330_s19, %s2331_s20  }
  0x52   : > { %s2891_s4 = sld [smem:[#allocation25_spill]] }
  0x58   : > { %s2143_s22 = scalar_lea.hbm %s2891_s4, 256 }
  0x59   : > { %p2144_p6 = scmp.ne.s32.totalorder %s2891_s4, %s2143_s22  ;;  %p2150_p5 = scmp.lt.u32.totalorder %s2143_s22, %s2891_s4 }
  0x5b   : > { %p2146_p10 = pnand %p2144_p6, %p2456_p13 }
  0x5d   : > { %p2147_p3 = pneg %p2146_p10 }
  0x5f   : > { %p2152_p7 = pnand %p2150_p5, %p2147_p3 }
  0x61   : > { %2155 = shalt.err (!%p2152_p7)
}
  0x62   : > { %s2156_s13 = scalar_lea.vmem %s279_s18, 256  ;;  %p2164_p1 = scmp.lt.s32.totalorder %s279_s18, %s279_s18 }
  0x63   : > { %p2157_p9 = scmp.ne.s32.totalorder %s279_s18, %s2156_s13  ;;  %p2165_p2 = scmp.lt.s32.totalorder %s2156_s13, %s2156_s13 }
  0x65   : > { %p2159_p12 = pnand %p2157_p9, %p2456_p13  ;;  %p2166_p4 = por %p2165_p2, %p2164_p1 }
  0x67   : > { %p2160_p0 = pneg %p2159_p12 }
  0x69   : > { %p2167_p8 = pnand %p2166_p4, %p2160_p0 }
  0x6b   : > { %2170 = shalt.err (!%p2167_p8)
}
  0x6c   : > { %1978 = dma.hbm_to_vmem [thread:$0]  (!%p2440_p11), %s2891_s4, 256, %s279_s18, [#allocation13], %s2330_s19, %s2330_s19, %s2331_s20  }
  0x6d   : > { %s55_s8 = sadd.s32 1, %s2313_s26  ;;  %s46_s14 = sadd.s32 1, %s2321_s28 }
  0x6e   : > { %p62_p4 = scmp.ne.s32.totalorder %s2313_s26, %s2309_s25  ;;  %p48_p8 = scmp.ge.s32.totalorder %s46_s14, 2 }
  0x6f   : > { %p63_p13 = scmp.eq.s32.totalorder %s2325_s29, 0  ;;  %p2892_p6 = scmp.eq.s32.totalorder %s2410_s30, 1 }
  0x70   : > { %p1993_p3 = scmp.lt.s32.totalorder %s2325_s29, 2  ;;  %s2913_s14 = smov (%p48_p8, %s46_s14), 0 }
  0x71   : > { %p2535_p10 = por %p2892_p6, %p62_p4  ;;  %p64_p5 = por %p63_p13, %p62_p4 }
  0x72   : > { %s298_s10 = sand.u32 1, %s2313_s26   ;;  %s50_s21 = ssub.s32 %s2321_s28, %s2913_s14 }
  0x73   : > { %s2893_s24 = scalar_select %p2535_p10, 1, 0 }
  0x74   : > { %p53_p11 = scmp.eq.s32.totalorder %s50_s21, 0  ;;  %s2545_s18 = sshll.u32 %s298_s10, 3 }
  0x75   : > { %s1780_s19 = sshll.u32 %s2321_s28, 7  ;;  %s302_s15 = scalar_lea.vmem [#allocation6], %s2545_s18 }
  0x76   : > { %s2549_s20 = scalar_select %p53_p11, %s2313_s26, %s55_s8  }
  0x77   : > { %s2554_s12 = scalar_lea.hbm %s2863_s0, %s1780_s19  ;;  %s310_s17 = sshll.u32 %s302_s15, 4  ;;  %s2557_s17 = int_to_ptr.vmem [resolvable:$true] %s310_s17 }
  0x78   : > { %p2561_p7 = pnand %p1993_p3, %p64_p5  ;;  %s2568_s8 = scalar_lea.hbm %s2864_s1, %s1780_s19 }
  0x79   : > { %s317_s21 = sand.u32 1, %s2325_s29   ;;  %s299_s22 = scalar_lea.sflag [#allocation7], %s298_s10 }
  0x7a   : > { %s2171_s23 = scalar_lea.hbm %s2554_s12, 128  ;;  %p2173_p12 = pneg %p2561_p7 }
  0x7b   : > { %p2172_p9 = scmp.ne.s32.totalorder %s2554_s12, %s2171_s23  ;;  %s2176_s3 = scalar_lea.hbm %s2863_s0, 256 }
  0x7c   : > { %p2177_p2 = scmp.lt.u32.totalorder %s2554_s12, %s2863_s0  ;;  %p2178_p4 = scmp.lt.u32.totalorder %s2176_s3, %s2171_s23 }
  0x7d   : > { %p2174_p0 = pnand %p2173_p12, %p2172_p9  ;;  %p2180_p13 = scmp.lt.u32.totalorder %s2171_s23, %s2554_s12 }
  0x7e   : > { %p2179_p8 = por %p2178_p4, %p2177_p2 }
  0x7f   : > { %p2175_p1 = pneg %p2174_p0 }
  0x80   : > { %p2181_p6 = por %p2180_p13, %p2179_p8 }
  0x82   : > { %p2182_p3 = pnand %p2181_p6, %p2175_p1 }
  0x84   : > { %2185 = shalt.err (!%p2182_p3)
}
  0x85   : > { %s2186_s10 = scalar_lea.vmem %s2557_s17, 128  ;;  %s2332_s2 = smov [#allocation6]  }
  0x86   : > { %p2187_p5 = scmp.ne.s32.totalorder %s2557_s17, %s2186_s10  ;;  %s2191_s19 = sshll.u32 %s2332_s2, 4  ;;  %s2192_s19 = int_to_ptr.vmem [resolvable:$false] %s2191_s19 }
  0x87   : > { %s2193_s4 = scalar_lea.vmem %s2192_s19, 256  ;;  %p2194_p0 = scmp.lt.s32.totalorder %s2557_s17, %s2192_s19 }
  0x88   : > { %p2189_p11 = pnand %p2187_p5, %p2173_p12  ;;  %p2195_p2 = scmp.lt.s32.totalorder %s2193_s4, %s2186_s10 }
  0x8a   : > { %p2190_p9 = pneg %p2189_p11  ;;  %p2196_p4 = por %p2195_p2, %p2194_p0 }
  0x8c   : > { %p2197_p8 = pnand %p2196_p4, %p2190_p9 }
  0x8e   : > { %2200 = shalt.err (!%p2197_p8)
}
  0x8f   : > { %1982 = dma.hbm_to_vmem [thread:$0]  (!%p2561_p7), %s2554_s12, 128, %s2557_s17, %s299_s22  }
  0x90   : > { %s321_s3 = scalar_lea.vmem [#allocation9], %s2545_s18  ;;  %s318_s23 = scalar_lea.sflag [#allocation10], %s317_s21 }
  0x91   : > { %s329_s7 = sshll.u32 %s321_s3, 4  ;;  %s2201_s15 = scalar_lea.hbm %s2568_s8, 128  ;;  %s330_s7 = int_to_ptr.vmem [resolvable:$true] %s329_s7 }
  0x92   : > { %p2202_p1 = scmp.ne.s32.totalorder %s2568_s8, %s2201_s15  ;;  %s2206_s2 = scalar_lea.hbm %s2864_s1, 256 }
  0x93   : > { %p2207_p3 = scmp.lt.u32.totalorder %s2568_s8, %s2864_s1  ;;  %p2208_p5 = scmp.lt.u32.totalorder %s2206_s2, %s2201_s15 }
  0x94   : > { %p2204_p13 = pnand %p2202_p1, %p2173_p12  ;;  %p2210_p9 = scmp.lt.u32.totalorder %s2201_s15, %s2568_s8 }
  0x95   : > { %p2209_p11 = por %p2208_p5, %p2207_p3 }
  0x96   : > { %p2205_p6 = pneg %p2204_p13 }
  0x97   : > { %p2211_p0 = por %p2210_p9, %p2209_p11 }
  0x99   : > { %p2212_p2 = pnand %p2211_p0, %p2205_p6 }
  0x9b   : > { %2215 = shalt.err (!%p2212_p2)
}
  0x9c   : > { %s2216_s18 = scalar_lea.vmem %s330_s7, 128  ;;  %s2333_s12 = smov [#allocation9]  }
  0x9d   : > { %p2217_p4 = scmp.ne.s32.totalorder %s330_s7, %s2216_s18  ;;  %s2221_s17 = sshll.u32 %s2333_s12, 4  ;;  %s2222_s17 = int_to_ptr.vmem [resolvable:$false] %s2221_s17 }
  0x9e   : > { %s2223_s21 = scalar_lea.vmem %s2222_s17, 256  ;;  %p2224_p13 = scmp.lt.s32.totalorder %s330_s7, %s2222_s17 }
  0x9f   : > { %p2219_p8 = pnand %p2217_p4, %p2173_p12  ;;  %p2225_p10 = scmp.lt.s32.totalorder %s2223_s21, %s2216_s18 }
  0xa1   : > { %p2220_p1 = pneg %p2219_p8  ;;  %p2226_p3 = por %p2225_p10, %p2224_p13 }
  0xa3   : > { %p2227_p5 = pnand %p2226_p3, %p2220_p1 }
  0xa5   : > { %2230 = shalt.err (!%p2227_p5)
}
  0xa6   : > { %1985 = dma.hbm_to_vmem [thread:$0]  (!%p2561_p7), %s2568_s8, 128, %s330_s7, %s318_s23  }
  0xa7   : > { %p2895_p6 = scmp.ne.s32.totalorder %s2886_s11, 0 }
  0xa8   : > { %s2621_s22 = sand.u32 (!%p2895_p6), 1, %s2309_s25   ;;  %p2896_p10 = scmp.ne.s32.totalorder (!%p2895_p6), %s2883_s9, 0 }
  0xa9   : > { %338 = sbr.rel (%p2895_p6) target bundleno = 1727 (0x6bf), region = 48  ;;  %s2624_s3 = sshll.u32 (!%p2895_p6), %s2621_s22, 3 }
  0xaa   : > { %s341_s15 = scalar_lea.sflag (!%p2895_p6), [#allocation7], %s2621_s22  ;;  %s344_s16 = scalar_lea.vmem (!%p2895_p6), [#allocation6], %s2624_s3 }
  0xb0   : > { %2284 = dma.done.wait (%p2896_p10), %s341_s15, 128  }
  0xb1   : > { %2286 = vsyncadd (%p2896_p10), %s341_s15, 4294967168  ;;  %s349_s11 = sand.u32 1, %s2410_s30   ;;  %s353_s8 = scalar_lea.vmem [#allocation9], %s2624_s3 }
  0xb2   : > { %s350_s13 = scalar_lea.sflag [#allocation10], %s349_s11 }
  0xb3   : > { %2288 = dma.done.wait (%p2896_p10), %s350_s13, 128  }
  0xb4   : > { %2290 = vsyncadd (%p2896_p10), %s350_s13, 4294967168  ;;  %p2897_p7 = scmp.eq.s32.totalorder %s2410_s30, 0 }
  0xb6   : > { %2292 = dma.done.wait (%p2897_p7), [#allocation10], 256   ;;  %p2898_p12 = pmov %p2897_p7 }
  0xb7   : > { %p2899_p11 = pmov %p2897_p7 }
  0xb8   : > { %2294 = vsyncadd (%p2898_p12), [#allocation10], 4294967040 }
  0xb9   : > { %2296 = dma.done.wait (%p2899_p11), [#allocation13], 512   ;;  %p2900_p9 = pmov %p2897_p7 }
  0xba   : > { %v406_v0 = vld [vmem:[%s344_s16] sm:$0xff]  ;;  %v669_v1 = vld [vmem:[%s353_s8] sm:$0xff]  ;;  %vm455_vm0 = vcmask 261120   ;;  %v2334_v24 = vmov 0.0   ;;  %vm2335_vm1 = vmmov 0   ;;  %vm657_vm2 = vcmask 64512  }
  0xbb   : > { %2298 = vsyncadd (%p2900_p9), [#allocation13], 4294966784  ;;  %407 = vxpose.xlu0.b32.start.end [1/1] (short) (narrow) %v406_v0, 32  ;;  %v2057_v2 = vld [vmem:[#allocation11] sm:$0xff]   ;;  %v2059_v3 = vld [vmem:[#allocation12] sm:$0xff]   ;;  %658 = vst.msk [vmem:[#allocation5] sm:$0xff] %vm657_vm2, %v2334_v24  ;;  %v855_v58 = vlaneseq }
  0xbc   : > { %1859 = vmatprep.mubr.msk.bf16.mxu0 %vm455_vm0, %v2057_v2  ;;  %1867 = vmatprep.mubr.msk.bf16.mxu1 %vm455_vm0, %v2059_v3  ;;  %v2058_v10 = vld [vmem:[#allocation11 + $0x8] sm:$0xff]   ;;  %v2060_v17 = vld [vmem:[#allocation12 + $0x8] sm:$0xff]   ;;  %v2061_v22 = vld [vmem:[#allocation14] sm:$0xff]   ;;  %659 = vst.msk [vmem:[#allocation5 + $0x8] sm:$0xff] %vm657_vm2, %v2334_v24  ;;  %vm869_vm3 = vcmask 1043456   ;;  %vm643_vm4 = vcmask 60416  }
  0xbd   : > { %v2062_v23 = vld [vmem:[#allocation14 + $0x8] sm:$0xff]   ;;  %660 = vst.msk [vmem:[#allocation5 + $0x10] sm:$0xff] %vm657_vm2, %v2334_v24  ;;  %661 = vst.msk [vmem:[#allocation5 + $0x18] sm:$0xff] %vm657_vm2, %v2334_v24  ;;  %vm648_vm5 = vcmask 7168   ;;  %v2336_v57 = vmov -1e+30  }
  0xbe   : > { %649 = vst.msk [vmem:[#allocation3] sm:$0xff] %vm648_vm5, %v2336_v57  ;;  %650 = vst.msk [vmem:[#allocation3 + $0x8] sm:$0xff] %vm648_vm5, %v2336_v57  ;;  %v856_v59 = vshrl.u32 %v855_v58, 7  ;;  %v860_v60 = vand.u32 127, %v855_v58  ;;  %s1816_s17 = sshll.u32 %s2317_s27, 7  ;;  %s400_s21 = scalar_lea.vmem [#allocation15], %s2624_s3 }
  0xbf   : > { %651 = vst.msk [vmem:[#allocation3 + $0x10] sm:$0xff] %vm648_vm5, %v2336_v57  ;;  %652 = vst.msk [vmem:[#allocation3 + $0x18] sm:$0xff] %vm648_vm5, %v2336_v57  ;;  %s1637_s15 = sshll.u32 %s400_s21, 4  ;;  %s2901_s13 = sld [smem:[#allocation26_spill]]  ;;  %s2815_s15 = int_to_ptr.vmem [resolvable:$true] %s1637_s15 }
  0xc0   : > { %653 = vst.msk [vmem:[#allocation4] sm:$0xff] %vm648_vm5, %v2334_v24  ;;  %654 = vst.msk [vmem:[#allocation4 + $0x8] sm:$0xff] %vm648_vm5, %v2334_v24  ;;  %vm863_vm6 = vcmp.gt.s32.totalorder %v860_v60, %v856_v59  ;;  %s1623_s30 = scalar_lea.sflag [#allocation8], %s2621_s22  ;;  %s2231_s27 = scalar_lea.vmem %s2815_s15, 128 }
  0xc1   : > { %655 = vst.msk [vmem:[#allocation4 + $0x10] sm:$0xff] %vm648_vm5, %v2334_v24  ;;  %656 = vst.msk [vmem:[#allocation4 + $0x18] sm:$0xff] %vm648_vm5, %v2334_v24  ;;  %v864_v61 = vsel %vm863_vm6, -1e+30, %v2334_v24  ;;  %p2232_p0 = scmp.ne.s32.totalorder %s2815_s15, %s2231_s27  ;;  %p2902_p2 = scmp.ne.s32.totalorder %s2893_s24, 0 }
  0xc2   : > { %s2338_s3 = smov [#allocation15]  }
  0xc3   : > { %p2233_p4 = pnand %p2232_p0, %p2902_p2  ;;  %s2235_s9 = sshll.u32 %s2338_s3, 4  ;;  %s2236_s9 = int_to_ptr.vmem [resolvable:$false] %s2235_s9 }
  0xc4   : > { %s2237_s7 = scalar_lea.vmem %s2236_s9, 256  ;;  %p2238_p1 = scmp.lt.s32.totalorder %s2815_s15, %s2236_s9 }
  0xc5   : > { %s2813_s8 = scalar_lea.hbm %s2901_s13, %s1816_s17  ;;  %p2234_p8 = pneg %p2233_p4 }
  0xc6   : > { %p2239_p13 = scmp.lt.s32.totalorder %s2237_s7, %s2231_s27 }
  0xc8   : > { %670 = vxpose.xlu0.b32.start.end [1/1] (short) (narrow) %v669_v1, 32  ;;  %p2240_p3 = por %p2239_p13, %p2238_p1 }
  0xca   : > { %p2241_p5 = pnand %p2240_p3, %p2234_p8 }
 0x13b   : > { %v423_v4 = vpop.trf.xlu0 }
 0x13f   : > { %v424_v5 = vpop.trf.xlu0 }
 0x140   : > { %v439_v6 = vpack.c.bf16 %v424_v5, %v423_v4 }
 0x142   : > { %1855 = vmatprep.subr.bf16.mxu0 %v439_v6 }
 0x143   : > { %1856 = vmatpush3.bf16.msra.mxu0 %v439_v6  ;;  %v425_v7 = vpop.trf.xlu0 }
 0x147   : > { %v426_v8 = vpop.trf.xlu0 }
 0x148   : > { %v440_v9 = vpack.c.bf16 %v426_v8, %v425_v7 }
 0x14a   : > { %1857 = vmatprep.subr.bf16.mxu0 %v440_v9 }
 0x14b   : > { %1858 = vmatpush3.bf16.msra.mxu0 %v440_v9  ;;  %v686_v11 = vpop.trf.xlu0 }
 0x14e   : > { %1860 = vmatmul.mubr.msk.bf16.vlgmr.msra.gmra.mrb[0].mxu0 %vm455_vm0, %v2058_v10 }
 0x14f   : > { %v687_v12 = vpop.trf.xlu0  ;;  %1875 = vmatprep.mubr.msk.bf16.mxu0 %vm455_vm0, %v2061_v22  ;;  %v2337_v22 = vmov 0  }
 0x150   : > { %v702_v13 = vpack.c.bf16 %v687_v12, %v686_v11  ;;  %2056 = vset.pattern.permute.xlu0 %v2337_v22 }
 0x152   : > { %1863 = vmatprep.subr.bf16.mxu1 %v702_v13  ;;  %1871 = vmatprep.subr.bf16.mxu0 %v702_v13 }
 0x153   : > { %1864 = vmatpush3.bf16.msra.mxu1 %v702_v13  ;;  %1872 = vmatpush3.bf16.msra.mxu0 %v702_v13  ;;  %v688_v14 = vpop.trf.xlu0 }
 0x157   : > { %v689_v15 = vpop.trf.xlu0 }
 0x158   : > { %v703_v16 = vpack.c.bf16 %v689_v15, %v688_v14 }
 0x15a   : > { %1865 = vmatprep.subr.bf16.mxu1 %v703_v16  ;;  %1873 = vmatprep.subr.bf16.mxu0 %v703_v16 }
 0x15b   : > { %1866 = vmatpush3.bf16.msra.mxu1 %v703_v16  ;;  %1874 = vmatpush3.bf16.msra.mxu0 %v703_v16 }
 0x15c   : > { %1879 = vmatprep.subr.bf16.mxu1 %v2334_v24  ;;  %1885 = vmatprep.subr.bf16.mxu0 %v2334_v24 }
 0x15e   : > { %1868 = vmatmul.mubr.msk.bf16.vlgmr.msra.gmra.mrb[0].mxu1 %vm455_vm0, %v2060_v17  ;;  %1876 = vmatmul.mubr.msk.bf16.vlgmr.msra.gmra.mrb[4].mxu0 %vm455_vm0, %v2062_v23  ;;  %v2715_v23 = vld [vmem:[#allocation3] sm:$0xff] }
 0x15f   : > { %1881 = vmatprep.mubr.msk.bf16.mxu1 %vm2335_vm1, %v2334_v24  ;;  %1887 = vmatprep.mubr.msk.bf16.mxu0 %vm2335_vm1, %v2334_v24 }
 0x221   : > { %v1861_v18 = vpop.f32.mrb[0].mxu0 }
 0x222   : > { %v496_v19 = vpop.f32.mrb[1].mxu0 }
 0x223   : > { %511 = vxpose.xlu1.b32.start.end [1/1] (short) (narrow) %v496_v19, 8  ;;  %v1862_v20 = vpop.f32.mrb[2].mxu0 }
 0x224   : > { %v499_v21 = vpop.f32.mrb[3].mxu0 }
 0x227   : > { %543 = vxpose.xlu1.b32.start.end [1/1] (short) (narrow) %v499_v21, 8 }
 0x22b   : > { %575 = vxpose.xlu1.b32.start.end [1/1] (short) (narrow) %v1861_v18, 8 }
 0x22f   : > { %607 = vxpose.xlu1.b32.start.end [1/1] (short) (narrow) %v1862_v20, 8 }
 0x231   : > { %v1869_v25 = vpop.f32.mrb[0].mxu1  ;;  %v2690_v49 = vpop.f32.mrb[4].mxu0 }
 0x232   : > { %v759_v26 = vpop.f32.mrb[1].mxu1  ;;  %v845_v37 = vpack.c.bf16 %v1869_v25, %v1869_v25  ;;  %v828_v50 = vpop.f32.mrb[5].mxu0 }
 0x233   : > { %v843_v27 = vpack.c.bf16 %v759_v26, %v759_v26  ;;  %v1870_v28 = vpop.f32.mrb[2].mxu1  ;;  %v847_v51 = vpack.c.bf16 %v828_v50, %v828_v50  ;;  %v2692_v52 = vpop.f32.mrb[6].mxu0 }
 0x234   : > { %v762_v29 = vpop.f32.mrb[3].mxu1  ;;  %v963_v41 = vsel %vm869_vm3, %v845_v37, 0  ;;  %v846_v42 = vpack.c.bf16 %v1870_v28, %v1870_v28  ;;  %v831_v53 = vpop.f32.mrb[7].mxu0  ;;  %v850_v59 = vpack.c.bf16 %v2692_v52, %v2692_v52 }
 0x235   : > { %v871_v30 = vsel %vm869_vm3, %v843_v27, 0  ;;  %v844_v31 = vpack.c.bf16 %v762_v29, %v762_v29  ;;  %v1152_v54 = vsel %vm657_vm2, %v847_v51, 0  ;;  %v848_v55 = vpack.c.bf16 %v831_v53, %v831_v53  ;;  %v2720_v27 = vld [vmem:[#allocation3 + $0x8] sm:$0xff] }
 0x236   : > { %1880 = vmatpush3.bf16.msra.mxu1 %v871_v30  ;;  %v1009_v46 = vsel %vm869_vm3, %v846_v42, 0  ;;  %v849_v53 = vpack.c.bf16 %v2690_v49, %v2690_v49 }
 0x237   : > { %v917_v32 = vsel %vm869_vm3, %v844_v31, 0  ;;  %1891 = vmatprep.subr.bf16.mxu1 %v2334_v24  ;;  %v1198_v56 = vsel %vm657_vm2, %v848_v55, 0  ;;  %v2728_v31 = vld [vmem:[#allocation3 + $0x10] sm:$0xff] }
 0x238   : > { %1886 = vmatpush3.bf16.msra.mxu0 %v917_v32  ;;  %v1244_v58 = vsel %vm657_vm2, %v849_v53, 0 }
 0x239   : > { %1897 = vmatprep.subr.bf16.mxu0 %v2334_v24 }
 0x24d   : > { %2055 = vset.pattern.permute.xlu1 %v2337_v22 }
 0x2a3   : > { %v527_v33 = vpop.trf.xlu1 }
 0x2a4   : > { %v639_v34 = vpack.c.bf16 %v527_v33, %v527_v33 }
 0x2a6   : > { %644 = vst.msk [vmem:[#allocation2] sm:$0xf] %vm643_vm4, %v639_v34 }
 0x2a7   : > { %v559_v35 = vpop.trf.xlu1 }
 0x2a8   : > { %v640_v36 = vpack.c.bf16 %v559_v35, %v559_v35  ;;  %v2733_v35 = vld [vmem:[#allocation3 + $0x18] sm:$0xff] }
 0x2aa   : > { %645 = vst.msk [vmem:[#allocation2 + $0x4] sm:$0xf] %vm643_vm4, %v640_v36 }
 0x2ab   : > { %v591_v38 = vpop.trf.xlu1 }
 0x2ac   : > { %v641_v39 = vpack.c.bf16 %v591_v38, %v591_v38 }
 0x2ad   : > { %v851_v40 = vld [vmem:[#allocation2] sm:$0xf] }
 0x2ae   : > { %646 = vst.msk [vmem:[#allocation2 + $0x8] sm:$0xf] %vm643_vm4, %v641_v39  ;;  %1882 = vmatmul.mubr.msk.bf16.vlgmr.msra.gmra.mrb[4].mxu1 %vm657_vm2, %v851_v40 }
 0x2af   : > { %1892 = vmatpush3.bf16.msra.mxu1 %v963_v41  ;;  %v623_v43 = vpop.trf.xlu1  ;;  %1893 = vmatprep.mubr.msk.bf16.mxu1 %vm2335_vm1, %v2334_v24 }
 0x2b0   : > { %v642_v44 = vpack.c.bf16 %v623_v43, %v623_v43  ;;  %1903 = vmatprep.subr.bf16.mxu1 %v2334_v24 }
 0x2b1   : > { %v852_v45 = vld [vmem:[#allocation2 + $0x4] sm:$0xf] }
 0x2b2   : > { %647 = vst.msk [vmem:[#allocation2 + $0xc] sm:$0xf] %vm643_vm4, %v642_v44  ;;  %1888 = vmatmul.mubr.msk.bf16.vlgmr.msra.gmra.mrb[8].mxu0 %vm657_vm2, %v852_v45 }
 0x2b3   : > { %1898 = vmatpush3.bf16.msra.mxu0 %v1009_v46  ;;  %1899 = vmatprep.mubr.msk.bf16.mxu0 %vm2335_vm1, %v2334_v24 }
 0x2b4   : > { %1909 = vmatprep.subr.bf16.mxu0 %v2334_v24 }
 0x2b5   : > { %v853_v47 = vld [vmem:[#allocation2 + $0x8] sm:$0xf] }
 0x2b6   : > { %1894 = vmatmul.mubr.msk.bf16.vlgmr.msra.gmra.mrb[8].mxu1 %vm657_vm2, %v853_v47 }
 0x2b7   : > { %1905 = vmatprep.mubr.msk.bf16.mxu1 %vm2335_vm1, %v2334_v24 }
 0x2b8   : > { %1904 = vmatpush3.bf16.xpose.msra.mxu1 %v1152_v54 }
 0x2b9   : > { %v854_v48 = vld [vmem:[#allocation2 + $0xc] sm:$0xf]  ;;  %1915 = vmatprep.subr.bf16.mxu1 %v2334_v24 }
 0x2ba   : > { %1900 = vmatmul.mubr.msk.bf16.vlgmr.msra.gmra.mrb[12].mxu0 %vm657_vm2, %v854_v48 }
 0x2bb   : > { %1911 = vmatprep.mubr.msk.bf16.mxu0 %vm2335_vm1, %v2334_v24 }
 0x2bc   : > { %1910 = vmatpush3.bf16.xpose.msra.mxu0 %v1198_v56 }
 0x2bd   : > { %1921 = vmatprep.subr.bf16.mxu0 %v2334_v24 }
 0x381   : > { %v907_v62 = vpop.f32.mrb[4].mxu1 }
 0x382   : > { %v908_v63 = vadd.f32 %v907_v62, %v864_v61  ;;  %v1883_v0 = vpop.f32.mrb[5].mxu1  ;;  %v1290_v62 = vsel %vm657_vm2, %v850_v59, 0 }
 0x383   : > { %v910_v1 = vpop.f32.mrb[6].mxu1 }
 0x384   : > { %v1884_v2 = vpop.f32.mrb[7].mxu1  ;;  %v1055_v3 = vsel %vm657_vm2, %v908_v63, -inf }
 0x385   : > { %1056 = vmax.xlane.f32.xlu1 %v1055_v3  ;;  %v953_v4 = vpop.f32.mrb[8].mxu0 }
 0x386   : > { %v954_v5 = vadd.f32 %v953_v4, %v864_v61  ;;  %v1889_v6 = vpop.f32.mrb[9].mxu0 }
 0x387   : > { %v956_v7 = vpop.f32.mrb[10].mxu0 }
 0x388   : > { %v1890_v8 = vpop.f32.mrb[11].mxu0  ;;  %v1058_v9 = vsel %vm657_vm2, %v954_v5, -inf }
 0x389   : > { %v999_v10 = vpop.f32.mrb[8].mxu1  ;;  %1059 = vmax.xlane.f32.xlu0 %v1058_v9 }
 0x38a   : > { %v1000_v11 = vadd.f32 %v999_v10, %v864_v61  ;;  %v1895_v12 = vpop.f32.mrb[9].mxu1 }
 0x38b   : > { %v1002_v13 = vpop.f32.mrb[10].mxu1  ;;  %v1415_v12 = vld [vmem:[%s2868_s5] sm:$0xf] }
 0x38c   : > { %v1896_v14 = vpop.f32.mrb[11].mxu1  ;;  %v1061_v15 = vsel %vm657_vm2, %v1000_v11, -inf  ;;  %v1425_v13 = vsel %vm869_vm3, %v1415_v12, 0 }
 0x38d   : > { %1062 = vmax.xlane.f32.xlu1 %v1061_v15  ;;  %v1045_v16 = vpop.f32.mrb[12].mxu0  ;;  %v1115_v14 = vld [vmem:[#allocation4] sm:$0xff] }
 0x38e   : > { %v1046_v17 = vadd.f32 %v1045_v16, %v864_v61  ;;  %v1901_v18 = vpop.f32.mrb[13].mxu0 }
 0x38f   : > { %v1048_v19 = vpop.f32.mrb[14].mxu0 }
 0x390   : > { %v1902_v20 = vpop.f32.mrb[15].mxu0  ;;  %v1064_v21 = vsel %vm657_vm2, %v1046_v17, -inf }
 0x391   : > { %1065 = vmax.xlane.f32.xlu1 %v1064_v21  ;;  %v1117_v21 = vld [vmem:[#allocation4 + $0x10] sm:$0xff] }
 0x412   : > { %v1057_v25 = vpop.xlane.xlu1 %1056 }
 0x413   : > { %v2718_v26 = vmax.f32 %v2715_v23, %v1057_v25 }
 0x415   : > { %v1071_v28 = vsub.f32 %v2715_v23, %v2718_v26  ;;  %1368 = vst.msk [vmem:[#allocation3] sm:$0xff] %vm648_vm5, %v2718_v26  ;;  %1085 = vperm.xlu1 %2055, %v2718_v26   ;;  %v1118_v26 = vld [vmem:[#allocation4 + $0x18] sm:$0xff] }
 0x416   : > { %v1060_v29 = vpop.xlane.xlu0 %1059 }
 0x417   : > { %v1068_v30 = vmax.f32 %v2720_v27, %v1060_v29 }
 0x419   : > { %v1072_v32 = vsub.f32 %v2720_v27, %v1068_v30  ;;  %1369 = vst.msk [vmem:[#allocation3 + $0x8] sm:$0xff] %vm648_vm5, %v1068_v30  ;;  %1090 = vperm.xlu0 %2056, %v1068_v30  }
 0x41a   : > { %v1063_v33 = vpop.xlane.xlu1 %1062 }
 0x41b   : > { %v1069_v34 = vmax.f32 %v2728_v31, %v1063_v33  ;;  %v1077_v2 = vmul.f32 1.442695, %v1072_v32 }
 0x41d   : > { %v1073_v36 = vsub.f32 %v2728_v31, %v1069_v34  ;;  %1370 = vst.msk [vmem:[#allocation3 + $0x10] sm:$0xff] %vm648_vm5, %v1069_v34  ;;  %1095 = vperm.xlu1 %2055, %v1069_v34  }
 0x41e   : > { %v1066_v37 = vpop.xlane.xlu1 %1065 }
 0x41f   : > { %v1070_v38 = vmax.f32 %v2733_v35, %v1066_v37  ;;  %v1079_v6 = vmul.f32 1.442695, %v1073_v36  ;;  %v1416_v36 = vld [vmem:[%s2868_s5 + $0x4] sm:$0xf] }
 0x421   : > { %v1074_v39 = vsub.f32 %v2733_v35, %v1070_v38  ;;  %1371 = vst.msk [vmem:[#allocation3 + $0x18] sm:$0xff] %vm648_vm5, %v1070_v38  ;;  %1100 = vperm.xlu1 %2055, %v1070_v38   ;;  %v1471_v38 = vsel %vm869_vm3, %v1416_v36, 0 }
 0x423   : > { %v1081_v7 = vmul.f32 1.442695, %v1074_v39 }
 0x494   : > { %v1086_v40 = vpop.permute.xlu1 %1085 }
 0x495   : > { %v1103_v41 = vsub.f32 %v908_v63, %v1086_v40 }
 0x497   : > { %v1107_v42 = vmul.f32 1.442695, %v1103_v41  ;;  %v1332_v41 = vld [vmem:[#allocation5] sm:$0xff] }
 0x498   : > { %v1091_v43 = vpop.permute.xlu0 %1090 }
 0x499   : > { %2063 = vpow2.f32 %v1107_v42  ;;  %v1104_v44 = vsub.f32 %v954_v5, %v1091_v43  ;;  %v1075_v5 = vmul.f32 1.442695, %v1071_v28 }
 0x49b   : > { %v1109_v45 = vmul.f32 1.442695, %v1104_v44  ;;  %v1333_v44 = vld [vmem:[#allocation5 + $0x8] sm:$0xff] }
 0x49c   : > { %v1096_v46 = vpop.permute.xlu1 %1095 }
 0x49d   : > { %2065 = vpow2.f32 %v1109_v45  ;;  %v1105_v47 = vsub.f32 %v1000_v11, %v1096_v46 }
 0x49f   : > { %v1111_v48 = vmul.f32 1.442695, %v1105_v47 }
 0x4a0   : > { %v1101_v50 = vpop.permute.xlu1 %1100 }
 0x4a1   : > { %2067 = vpow2.f32 %v1111_v48  ;;  %v1106_v51 = vsub.f32 %v1046_v17, %v1101_v50  ;;  %v1116_v17 = vld [vmem:[#allocation4 + $0x8] sm:$0xff] }
 0x4a3   : > { %v2064_v54 = vpop.eup %2063  ;;  %v1113_v55 = vmul.f32 1.442695, %v1106_v51 }
 0x4a4   : > { %v1123_v56 = vsel %vm657_vm2, %v2064_v54, 0.0  ;;  %v1144_v57 = vpack.c.bf16 %v2064_v54, %v2064_v54 }
 0x4a5   : > { %2069 = vpow2.f32 %v1113_v55  ;;  %1124 = vadd.xlane.f32.xlu1 %v1123_v56  ;;  %v1334_v55 = vld [vmem:[#allocation5 + $0x10] sm:$0xff] }
 0x4a6   : > { %1906 = vmatmul.mubr.msk.bf16.vlgmr.msra.gmra.mrb[12].mxu1 %vm657_vm2, %v1144_v57  ;;  %2071 = vpow2.f32 %v1077_v2 }
 0x4a7   : > { %v2066_v60 = vpop.eup %2065  ;;  %1916 = vmatpush3.bf16.xpose.msra.mxu1 %v1244_v58  ;;  %1917 = vmatprep.mubr.msk.bf16.mxu1 %vm2335_vm1, %v2334_v24  ;;  %2073 = vpow2.f32 %v1075_v5 }
 0x4a8   : > { %v1126_v49 = vsel %vm657_vm2, %v2066_v60, 0.0  ;;  %v1145_v61 = vpack.c.bf16 %v2066_v60, %v2066_v60  ;;  %1927 = vmatprep.subr.bf16.mxu1 %v2334_v24  ;;  %2075 = vpow2.f32 %v1079_v6 }
 0x4a9   : > { %1127 = vadd.xlane.f32.xlu0 %v1126_v49  ;;  %2077 = vpow2.f32 %v1081_v7 }
 0x4aa   : > { %1912 = vmatmul.mubr.msk.bf16.vlgmr.msra.gmra.mrb[16].mxu0 %vm657_vm2, %v1145_v61  ;;  %v1335_v61 = vld [vmem:[#allocation5 + $0x18] sm:$0xff] }
 0x4ab   : > { %v2068_v63 = vpop.eup %2067  ;;  %1922 = vmatpush3.bf16.xpose.msra.mxu0 %v1290_v62  ;;  %1923 = vmatprep.mubr.msk.bf16.mxu0 %vm2335_vm1, %v2334_v24 }
 0x4ac   : > { %v1129_v52 = vsel %vm657_vm2, %v2068_v63, 0.0  ;;  %v1146_v0 = vpack.c.bf16 %v2068_v63, %v2068_v63  ;;  %1933 = vmatprep.subr.bf16.mxu0 %v2334_v24 }
 0x4ad   : > { %1130 = vadd.xlane.f32.xlu1 %v1129_v52 }
 0x4ae   : > { %1918 = vmatmul.mubr.msk.bf16.vlgmr.msra.gmra.mrb[16].mxu1 %vm657_vm2, %v1146_v0 }
 0x4af   : > { %v2070_v1 = vpop.eup %2069  ;;  %1929 = vmatprep.mubr.msk.bf16.mxu1 %vm2335_vm1, %v2334_v24  ;;  %1928 = vmatpush3.bf16.msra.mxu1 %v1425_v13 }
 0x4b0   : > { %v1132_v3 = vsel %vm657_vm2, %v2070_v1, 0.0  ;;  %v1147_v4 = vpack.c.bf16 %v2070_v1, %v2070_v1  ;;  %v2072_v8 = vpop.eup %2071  ;;  %1939 = vmatprep.subr.bf16.mxu1 %v2334_v24 }
 0x4b1   : > { %1133 = vadd.xlane.f32.xlu1 %v1132_v3  ;;  %v2074_v9 = vpop.eup %2073  ;;  %v1120_v19 = vmul.f32 %v2072_v8, %v1116_v17  ;;  %v1418_v17 = vld [vmem:[%s2868_s5 + $0xc] sm:$0xf] }
 0x4b2   : > { %1924 = vmatmul.mubr.msk.bf16.vlgmr.msra.gmra.mrb[20].mxu0 %vm657_vm2, %v1147_v4  ;;  %v2076_v10 = vpop.eup %2075  ;;  %v1119_v15 = vmul.f32 %v2074_v9, %v1115_v14 }
 0x4b3   : > { %1935 = vmatprep.mubr.msk.bf16.mxu0 %vm2335_vm1, %v2334_v24  ;;  %v2078_v11 = vpop.eup %2077  ;;  %v1121_v23 = vmul.f32 %v2076_v10, %v1117_v21  ;;  %1934 = vmatpush3.bf16.msra.mxu0 %v1471_v38 }
 0x4b4   : > { %v1122_v29 = vmul.f32 %v2078_v11, %v1118_v26  ;;  %1945 = vmatprep.subr.bf16.mxu0 %v2334_v24 }
 0x4bf   : > { %1343 = vperm.xlu0 %2056, %v2072_v8  }
 0x4c2   : > { %1338 = vperm.xlu1 %2055, %v2074_v9  }
 0x4c6   : > { %1348 = vperm.xlu1 %2055, %v2076_v10  }
 0x4ca   : > { %1353 = vperm.xlu1 %2055, %v2078_v11   ;;  %v1417_v11 = vld [vmem:[%s2868_s5 + $0x8] sm:$0xf] }
 0x4cb   : > { %v1517_v14 = vsel %vm869_vm3, %v1417_v11, 0 }
 0x532   : > { %v1125_v16 = vpop.xlane.xlu1 %1124 }
 0x533   : > { %v1135_v18 = vadd.f32 %v1125_v16, %v1119_v15 }
 0x535   : > { %1140 = vst.msk [vmem:[#allocation4] sm:$0xff] %vm648_vm5, %v1135_v18 }
 0x536   : > { %v1128_v20 = vpop.xlane.xlu0 %1127 }
 0x537   : > { %v1136_v22 = vadd.f32 %v1128_v20, %v1120_v19  ;;  %v1563_v20 = vsel %vm869_vm3, %v1418_v17, 0 }
 0x539   : > { %1141 = vst.msk [vmem:[#allocation4 + $0x8] sm:$0xff] %vm648_vm5, %v1136_v22 }
 0x53a   : > { %v1131_v25 = vpop.xlane.xlu1 %1130 }
 0x53b   : > { %v1137_v27 = vadd.f32 %v1131_v25, %v1121_v23 }
 0x53c   : > { %v1375_v28 = vld [vmem:[#allocation4] sm:$0xff] }
 0x53d   : > { %1142 = vst.msk [vmem:[#allocation4 + $0x10] sm:$0xff] %vm648_vm5, %v1137_v27  ;;  %2079 = vrcp.f32 %v1375_v28 }
 0x53e   : > { %v1134_v30 = vpop.xlane.xlu1 %1133  ;;  %v1344_v45 = vpop.permute.xlu0 %1343 }
 0x53f   : > { %v1138_v31 = vadd.f32 %v1134_v30, %v1122_v29  ;;  %v1357_v53 = vmul.f32 %v1344_v45, %v1333_v44 }
 0x540   : > { %v1376_v32 = vld [vmem:[#allocation4 + $0x8] sm:$0xff] }
 0x541   : > { %1143 = vst.msk [vmem:[#allocation4 + $0x18] sm:$0xff] %vm648_vm5, %v1138_v31  ;;  %2081 = vrcp.f32 %v1376_v32 }
 0x542   : > { %v1339_v42 = vpop.permute.xlu1 %1338 }
 0x543   : > { %v1356_v43 = vmul.f32 %v1339_v42, %v1332_v41 }
 0x544   : > { %v1377_v33 = vld [vmem:[#allocation4 + $0x10] sm:$0xff] }
 0x545   : > { %2083 = vrcp.f32 %v1377_v33 }
 0x546   : > { %v1349_v50 = vpop.permute.xlu1 %1348 }
 0x547   : > { %v2080_v34 = vpop.eup %2079  ;;  %v1358_v60 = vmul.f32 %v1349_v50, %v1334_v55 }
 0x548   : > { %1389 = vperm.xlu1 %2055, %v2080_v34   ;;  %v1378_v35 = vld [vmem:[#allocation4 + $0x18] sm:$0xff] }
 0x549   : > { %2085 = vrcp.f32 %v1378_v35 }
 0x54a   : > { %v1354_v62 = vpop.permute.xlu1 %1353 }
 0x54b   : > { %v2082_v37 = vpop.eup %2081  ;;  %v1359_v2 = vmul.f32 %v1354_v62, %v1335_v61 }
 0x54c   : > { %1394 = vperm.xlu1 %2055, %v2082_v37  }
 0x54f   : > { %v2084_v39 = vpop.eup %2083 }
 0x550   : > { %1399 = vperm.xlu1 %2055, %v2084_v39  }
 0x553   : > { %v2086_v40 = vpop.eup %2085 }
 0x554   : > { %1404 = vperm.xlu1 %2055, %v2086_v40  }
 0x579   : > { %v1188_v46 = vpop.f32.mrb[12].mxu1 }
 0x57a   : > { %v1360_v47 = vadd.f32 %v1356_v43, %v1188_v46  ;;  %v1907_v48 = vpop.f32.mrb[13].mxu1 }
 0x57b   : > { %v1191_v51 = vpop.f32.mrb[14].mxu1  ;;  %v1814_v48 = vld [vmem:[%s2869_s6] ss:$0 sm:$0xff] }
 0x57c   : > { %1364 = vst.msk [vmem:[#allocation5] sm:$0xff] %vm657_vm2, %v1360_v47  ;;  %v1908_v54 = vpop.f32.mrb[15].mxu1 }
 0x57d   : > { %v1234_v56 = vpop.f32.mrb[16].mxu0 }
 0x57e   : > { %v1361_v57 = vadd.f32 %v1357_v53, %v1234_v56  ;;  %v1913_v58 = vpop.f32.mrb[17].mxu0 }
 0x57f   : > { %v1237_v59 = vpop.f32.mrb[18].mxu0 }
 0x580   : > { %1365 = vst.msk [vmem:[#allocation5 + $0x8] sm:$0xff] %vm657_vm2, %v1361_v57  ;;  %v1914_v49 = vpop.f32.mrb[19].mxu0 }
 0x581   : > { %v1280_v63 = vpop.f32.mrb[16].mxu1 }
 0x582   : > { %v1362_v52 = vadd.f32 %v1358_v60, %v1280_v63  ;;  %v1919_v0 = vpop.f32.mrb[17].mxu1 }
 0x583   : > { %v1283_v1 = vpop.f32.mrb[18].mxu1  ;;  %v1383_v9 = vld [vmem:[#allocation5] sm:$0xff] }
 0x584   : > { %1366 = vst.msk [vmem:[#allocation5 + $0x10] sm:$0xff] %vm657_vm2, %v1362_v52  ;;  %v1920_v3 = vpop.f32.mrb[19].mxu1 }
 0x585   : > { %v1326_v4 = vpop.f32.mrb[20].mxu0 }
 0x586   : > { %v1363_v5 = vadd.f32 %v1359_v2, %v1326_v4  ;;  %v1925_v6 = vpop.f32.mrb[21].mxu0 }
 0x587   : > { %v1329_v7 = vpop.f32.mrb[22].mxu0  ;;  %v1384_v16 = vld [vmem:[#allocation5 + $0x8] sm:$0xff] }
 0x588   : > { %1367 = vst.msk [vmem:[#allocation5 + $0x18] sm:$0xff] %vm657_vm2, %v1363_v5  ;;  %v1926_v8 = vpop.f32.mrb[23].mxu0 }
 0x58b   : > { %v1385_v21 = vld [vmem:[#allocation5 + $0x10] sm:$0xff] }
 0x58f   : > { %v1386_v27 = vld [vmem:[#allocation5 + $0x18] sm:$0xff] }
 0x5c7   : > { %v1390_v10 = vpop.permute.xlu1 %1389 }
 0x5c8   : > { %v1407_v12 = vmul.f32 %v1390_v10, %v1383_v9 }
 0x5ca   : > { %v1411_v13 = vpack.c.bf16 %v1407_v12, %v1407_v12 }
 0x5cb   : > { %v1395_v15 = vpop.permute.xlu1 %1394 }
 0x5cc   : > { %v1408_v18 = vmul.f32 %v1395_v15, %v1384_v16  ;;  %1930 = vmatmul.mubr.msk.bf16.vlgmr.msra.gmra.mrb[20].mxu1 %vm657_vm2, %v1411_v13 }
 0x5cd   : > { %1940 = vmatpush3.bf16.msra.mxu1 %v1517_v14  ;;  %1941 = vmatprep.mubr.msk.bf16.mxu1 %vm2335_vm1, %v2334_v24 }
 0x5ce   : > { %v1412_v19 = vpack.c.bf16 %v1408_v18, %v1408_v18 }
 0x5cf   : > { %v1400_v22 = vpop.permute.xlu1 %1399 }
 0x5d0   : > { %v1409_v23 = vmul.f32 %v1400_v22, %v1385_v21  ;;  %1936 = vmatmul.mubr.msk.bf16.vlgmr.msra.gmra.mrb[24].mxu0 %vm657_vm2, %v1412_v19 }
 0x5d1   : > { %1946 = vmatpush3.bf16.msra.mxu0 %v1563_v20  ;;  %1947 = vmatprep.mubr.msk.bf16.mxu0 %vm2335_vm1, %v2334_v24 }
 0x5d2   : > { %v1413_v25 = vpack.c.bf16 %v1409_v23, %v1409_v23 }
 0x5d3   : > { %v1405_v26 = vpop.permute.xlu1 %1404 }
 0x5d4   : > { %v1410_v28 = vmul.f32 %v1405_v26, %v1386_v27  ;;  %1942 = vmatmul.mubr.msk.bf16.vlgmr.msra.gmra.mrb[24].mxu1 %vm657_vm2, %v1413_v25 }
 0x5d6   : > { %v1414_v29 = vpack.c.bf16 %v1410_v28, %v1410_v28 }
 0x5d8   : > { %1948 = vmatmul.mubr.msk.bf16.vlgmr.msra.gmra.mrb[28].mxu0 %vm657_vm2, %v1414_v29 }
 0x69f   : > { %v1461_v30 = vpop.f32.mrb[20].mxu1 }
 0x6a0   : > { %v1931_v31 = vpop.f32.mrb[21].mxu1  ;;  %v1606_v35 = vsel %vm455_vm0, %v1461_v30, 0.0 }
 0x6a1   : > { %v1464_v32 = vpop.f32.mrb[22].mxu1 }
 0x6a2   : > { %v1932_v33 = vpop.f32.mrb[23].mxu1 }
 0x6a3   : > { %v1507_v34 = vpop.f32.mrb[24].mxu0 }
 0x6a4   : > { %v1607_v36 = vsel %vm455_vm0, %v1507_v34, 0.0  ;;  %v1937_v24 = vpop.f32.mrb[25].mxu0 }
 0x6a5   : > { %v1608_v37 = vadd.f32 %v1607_v36, %v1606_v35  ;;  %v1510_v38 = vpop.f32.mrb[26].mxu0 }
 0x6a6   : > { %v1938_v39 = vpop.f32.mrb[27].mxu0 }
 0x6a7   : > { %v1553_v40 = vpop.f32.mrb[24].mxu1 }
 0x6a8   : > { %v1609_v41 = vsel %vm455_vm0, %v1553_v40, 0.0  ;;  %v1943_v42 = vpop.f32.mrb[25].mxu1 }
 0x6a9   : > { %v1610_v43 = vadd.f32 %v1609_v41, %v1608_v37  ;;  %v1556_v44 = vpop.f32.mrb[26].mxu1 }
 0x6aa   : > { %v1944_v45 = vpop.f32.mrb[27].mxu1 }
 0x6ab   : > { %v1599_v46 = vpop.f32.mrb[28].mxu0 }
 0x6ac   : > { %v1611_v47 = vsel %vm455_vm0, %v1599_v46, 0.0  ;;  %v1949_v50 = vpop.f32.mrb[29].mxu0 }
 0x6ad   : > { %v1612_v51 = vadd.f32 %v1611_v47, %v1610_v43  ;;  %v1602_v53 = vpop.f32.mrb[30].mxu0 }
 0x6ae   : > { %v1950_v54 = vpop.f32.mrb[31].mxu0 }
 0x6af   : > { %v1620_v55 = vadd.f32 %v1814_v48, %v1612_v51 }
 0x6b1   : > { %1621 = vst.msk [vmem:[%s400_s21] sm:$0xff] %vm455_vm0, %v1620_v55 }
 0x6b2   : > { %2244 = shalt.err (!%p2241_p5)
}
 0x6b3   : > { %s2245_s22 = scalar_lea.hbm %s2813_s8, 128  ;;  %s2249_s2 = scalar_lea.hbm %s2901_s13, 256 }
 0x6b4   : > { %p2246_p6 = scmp.ne.s32.totalorder %s2813_s8, %s2245_s22  ;;  %p2250_p12 = scmp.lt.u32.totalorder %s2813_s8, %s2901_s13 }
 0x6b5   : > { %p2251_p11 = scmp.lt.u32.totalorder %s2249_s2, %s2245_s22  ;;  %p2253_p0 = scmp.lt.u32.totalorder %s2245_s22, %s2813_s8 }
 0x6b6   : > { %p2247_p10 = pnand %p2246_p6, %p2902_p2 }
 0x6b7   : > { %p2252_p9 = por %p2251_p11, %p2250_p12 }
 0x6b8   : > { %p2248_p7 = pneg %p2247_p10 }
 0x6b9   : > { %p2254_p4 = por %p2253_p0, %p2252_p9 }
 0x6bb   : > { %p2255_p8 = pnand %p2254_p4, %p2248_p7 }
 0x6bd   : > { %2258 = shalt.err (!%p2255_p8)
}
 0x6be   : > { %1967 = dma.vmem_to_hbm [thread:$0]  (%p2902_p2), %s2815_s15, 128, %s2813_s8, %s1623_s30  }
 0x6bf PF: > { %s2903_s18 = sld [smem:[#allocation21_spill]]  ;;  %s2904_s12 = sld [smem:[#allocation22_spill]] }
 0x6c0   : > { %p2906_p13 = scmp.ge.s32.totalorder %s2325_s29, 2 }
 0x6c5   : > { %s1649_s17 = sand.u32 1, %s2903_s18   ;;  %p2905_p1 = scmp.ne.s32.totalorder %s2904_s12, 0 }
 0x6c6   : > { %s1650_s21 = scalar_lea.sflag [#allocation8], %s1649_s17 }
 0x6c7   : > { %p1987_p3 = pnand %p2906_p13, %p2905_p1 }
 0x6c9   : > { %2300 = dma.done.wait (!%p1987_p3), %s1650_s21, 128  }
 0x6ca   : > { %2302 = vsyncadd (!%p1987_p3), %s1650_s21, 4294967168  ;;  %s27_s29 = sadd.s32 1, %s2325_s29   ;;  %s2907_s24 = smov %s2309_s25 }
 0x6cb   : > { %p24_p5 = scmp.ge.s32.totalorder %s27_s29, 4   ;;  %s2908_s25 = smov %s2313_s26 }
 0x6cc   : > { %s2909_s26 = smov %s2549_s20  ;;  %s2910_s27 = smov %s2321_s28 }
 0x6cd   : > { %s2911_s28 = smov %s2913_s14  ;;  %26 = sbr.rel (!%p24_p5) target bundleno = 14 (0xe), region = 130 }
 0x6d4   :  { %1655 = vsyncpa [#allocation7], 1 }
 0x6d5   :  { %1657 = vsyncpa [#allocation7 + $0x1], 1 }
 0x6d6   :  { %1658 = vsyncpa [#allocation10], 1 }
 0x6d7   :  { %1660 = vsyncpa [#allocation10 + $0x1], 1 }
 0x6d8   :  { %1661 = vsyncpa [#allocation13], 1 }
 0x6d9   :  { %1662 = vsyncpa [#allocation8], 1 }
 0x6da   :  { %1664 = vsyncpa [#allocation8 + $0x1], 1 }

</bundles_post_ra>
